<compile_context>
chip_gen: v5e
topology: v5e:2x2
jax: 0.10.0
libtpu: 0.0.40
codegen_flags: <defaults>
</compile_context>

<pallas_src>
import jax
import jax.numpy as jnp
from jax.experimental import pallas as pl
from jax.experimental.pallas import tpu as pltpu

_LANE = 128
_VMEM_LIMIT_BYTES = 32 * 1024 * 1024   # safe on v5e/v6e (128 MiB) and v7x (64 MiB)
_MIN_SPLIT_BYTES = 512 * 1024          # below this a single block is fine everywhere


def _hardsigmoid_kernel(x_ref, o_ref):
    # f32 compute regardless of storage dtype (exact constants; HBM-bound so
    # the extra VPU work is free), cast back on store.
    x = x_ref[...].astype(jnp.float32)
    y = jnp.clip(x * 0.2 + 0.5, 0.0, 1.0)
    o_ref[...] = y.astype(o_ref.dtype)


def _sublane_multiple(dtype):
    # Packed sublane count: f32 -> 8, bf16 -> 16, int8/fp8 -> 32.
    itemsize = jnp.dtype(dtype).itemsize
    return max(8, 32 // itemsize)


def _run_2d(x2d, *, target_block_bytes, donate_input):
    """Run the elementwise kernel over a (rows, cols) slab, cols % 128 == 0."""
    rows, cols = x2d.shape
    dtype = x2d.dtype
    itemsize = jnp.dtype(dtype).itemsize
    sub = _sublane_multiple(dtype)
    total_bytes = rows * cols * itemsize

    # ~4 MiB per block (per buffer), rounded to the packed sublane count.
    max_block_rows = max(sub, (target_block_bytes // (cols * itemsize)) // sub * sub)

    if total_bytes < _MIN_SPLIT_BYTES or rows <= sub:
        # Tiny: one block. A full-dim block is always layout-legal.
        tile_rows = rows
    else:
        # Ensure >=2 grid steps (v7x dual-TensorCore sharding of the
        # "parallel" axis), capped at the ~4 MiB block target. A partial
        # trailing block (rows % tile_rows != 0) is handled by Pallas'
        # masked edge-block semantics — no padding copy needed.
        half_rows = max(sub, (pl.cdiv(rows, 2) // sub) * sub)
        tile_rows = min(max_block_rows, half_rows)

    grid = (pl.cdiv(rows, tile_rows),)

    n_elems = rows * cols
    cost = pl.CostEstimate(flops=2 * n_elems, transcendentals=0,
                           bytes_accessed=2 * n_elems * itemsize)

    extra = {}
    if donate_input:
        # Only useful if the caller actually donates the input buffer.
        extra["input_output_aliases"] = {0: 0}

    return pl.pallas_call(
        _hardsigmoid_kernel,
        out_shape=jax.ShapeDtypeStruct((rows, cols), dtype),
        grid_spec=pltpu.PrefetchScalarGridSpec(
            num_scalar_prefetch=0,
            grid=grid,
            in_specs=[pl.BlockSpec((tile_rows, cols), lambda i: (i, 0))],
            out_specs=pl.BlockSpec((tile_rows, cols), lambda i: (i, 0)),
        ),
        compiler_params=pltpu.CompilerParams(
            dimension_semantics=("parallel",),
            vmem_limit_bytes=_VMEM_LIMIT_BYTES),
        cost_estimate=cost,
        **extra,
    )(x2d)


def hardsigmoid(x, *, target_block_bytes=4 * 1024 * 1024, donate_input=False):
    """y = clamp(0.2*x + 0.5, 0, 1) elementwise, any float shape/dtype."""
    orig_shape = x.shape
    dtype = x.dtype
    n = x.size
    if n == 0:
        return x

    # Widest lane-dense width that divides n: every block DMA is a single
    # contiguous HBM stripe and every store is an unmasked, lane-dense vst.
    cols = None
    for c in (2048, 1024, 512, 256, 128):
        if n % c == 0:
            cols = c
            break

    x_flat = x.reshape(-1)

    if cols is not None:
        out2d = _run_2d(x_flat.reshape(n // cols, cols),
                        target_block_bytes=target_block_bytes,
                        donate_input=donate_input)
        return out2d.reshape(orig_shape)

    # Ragged path (n % 128 != 0): kernel on the divisible bulk, plain jnp on
    # the tiny (<128-element) tail. Avoids whole-tensor jnp.pad + out[:n] slice.
    cols = _LANE
    bulk = (n // cols) * cols
    tail = x_flat[bulk:]
    tail_out = jnp.clip(tail.astype(jnp.float32) * 0.2 + 0.5,
                        0.0, 1.0).astype(dtype)
    if bulk == 0:
        return tail_out.reshape(orig_shape)
    bulk_out = _run_2d(x_flat[:bulk].reshape(bulk // cols, cols),
                       target_block_bytes=target_block_bytes,
                       donate_input=donate_input)
    return jnp.concatenate([bulk_out.reshape(-1), tail_out]).reshape(orig_shape)


def hardsigmoid_ref(x):
    return jnp.clip(0.2 * x + 0.5, 0.0, 1.0)


if __name__ == "__main__":
    key = jax.random.PRNGKey(0)

    # Main test: NCHW input matching the module's expected use.
    x = jax.random.normal(key, (2, 4, 16, 16), dtype=jnp.float32) * 5.0
    y = jax.block_until_ready(hardsigmoid(x))
    assert y.shape == x.shape and y.dtype == x.dtype
    assert jnp.allclose(y, hardsigmoid_ref(x), atol=1e-6, rtol=1e-6)

    # Mid-size tensor: exercises the >=2-block grid path (v7x dual-TC sharding).
    x_mid = jax.random.normal(jax.random.PRNGKey(3), (2, 64, 32, 32),
                              dtype=jnp.float32) * 5.0
    y_mid = jax.block_until_ready(hardsigmoid(x_mid))
    assert jnp.allclose(y_mid, hardsigmoid_ref(x_mid), atol=1e-6, rtol=1e-6)

    # Ragged size (exercises the bulk + jnp-tail path, no pad/slice copies).
    x_odd = jax.random.normal(jax.random.PRNGKey(1), (3, 5, 7, 11),
                              dtype=jnp.float32) * 5.0
    y_odd = jax.block_until_ready(hardsigmoid(x_odd))
    assert y_odd.shape == x_odd.shape
    assert jnp.allclose(y_odd, hardsigmoid_ref(x_odd), atol=1e-6, rtol=1e-6)

    # bf16 input (f32 compute in-kernel, bf16 store).
    x_bf = (jax.random.normal(jax.random.PRNGKey(2), (2, 8, 16, 16),
                              dtype=jnp.float32) * 5.0).astype(jnp.bfloat16)
    y_bf = jax.block_until_ready(hardsigmoid(x_bf))
    assert y_bf.dtype == jnp.bfloat16
    assert jnp.allclose(y_bf.astype(jnp.float32),
                        hardsigmoid_ref(x_bf).astype(jnp.float32),
                        atol=1e-2, rtol=1e-2)

    print("KERNEL_OK")
</pallas_src>

<mosaic_0001>
module attributes {stable_mosaic.version = 11 : i64} {
  func.func @_hardsigmoid_kernel(%arg0: i32, %arg1: memref<1x2048xf32, #tpu.memory_space<vmem>>, %arg2: memref<1x2048xf32, #tpu.memory_space<vmem>>) attributes {dimension_semantics = [#tpu.dimension_semantics<parallel>], iteration_bounds = array<i64: 1>, scalar_prefetch = 0 : i64, scratch_operands = 0 : i64, tpu.core_type = #tpu.core_type<tc>, window_params = [{transform_indices = @transform_0, window_bounds = array<i64: 1, 2048>}, {transform_indices = @transform_1, window_bounds = array<i64: 1, 2048>}]} {
    %c0 = arith.constant 0 : index
    %c0_0 = arith.constant 0 : index
    %0 = vector.load %arg1[%c0, %c0_0] : memref<1x2048xf32, #tpu.memory_space<vmem>>, vector<1x2048xf32>
    %cst = arith.constant 2.000000e-01 : f32
    %1 = vector.broadcast %cst : f32 to vector<1x2048xf32>
    %2 = arith.mulf %0, %1 : vector<1x2048xf32>
    %cst_1 = arith.constant 5.000000e-01 : f32
    %3 = vector.broadcast %cst_1 : f32 to vector<1x2048xf32>
    %4 = arith.addf %2, %3 : vector<1x2048xf32>
    %cst_2 = arith.constant 0.000000e+00 : f32
    %cst_3 = arith.constant 1.000000e+00 : f32
    %5 = vector.broadcast %cst_2 : f32 to vector<1x2048xf32>
    %6 = arith.maximumf %5, %4 : vector<1x2048xf32>
    %7 = vector.broadcast %cst_3 : f32 to vector<1x2048xf32>
    %8 = arith.minimumf %7, %6 : vector<1x2048xf32>
    %c0_4 = arith.constant 0 : index
    %c0_5 = arith.constant 0 : index
    %9 = vector.load %arg2[%c0_4, %c0_5] : memref<1x2048xf32, #tpu.memory_space<vmem>>, vector<1x2048xf32>
    tpu.vector_store %arg2[%c0_4, %c0_5], %8 {strides = array<i32>} : memref<1x2048xf32, #tpu.memory_space<vmem>>, vector<1x2048xf32>,
    return
  }
  func.func @transform_0(%arg0: i32) -> (i32, i32) {
    %c0_i32 = arith.constant 0 : i32
    %c0_i32_0 = arith.constant 0 : i32
    return %arg0, %c0_i32 : i32, i32
  }
  func.func @transform_1(%arg0: i32) -> (i32, i32) {
    %c0_i32 = arith.constant 0 : i32
    %c0_i32_0 = arith.constant 0 : i32
    return %arg0, %c0_i32 : i32, i32
  }
}

</mosaic_0001>

<bundles_post_ra>
// kernel: tpu_custom_call.1
= control target key start
LH: loop header
LB: loop body
LE: loop exit
PB: predicated region body
PF: predicated region fallthrough
CT: control target
= control target key end

     0   :  { %6 = vsyncpa [#allocation3], 0  ;;  %s124_s0 = inlined_call_operand.hbm [shape: f32[1,2048], index: 0, kind: input, shape index: {}]   ;;  %s125_s1 = inlined_call_operand.hbm [shape: f32[1,2048], index: 1, kind: output, shape index: {}]  }
   0x1   :  { %7 = vsyncpa [#allocation4], 0  ;;  %s13_s8 = sshll.u32 %s124_s0, 4  ;;  %s106_s9 = smov [#allocation2]   ;;  %s14_s8 = int_to_ptr.hbm [resolvable:$true] %s13_s8 }
   0x2   :  { %s15_s10 = sshll.u32 %s106_s9, 4  ;;  %s16_s10 = int_to_ptr.vmem [resolvable:$true] %s15_s10 }
   0x3   :  { %18 = dma.hbm_to_vmem [thread:$0]  %s14_s8, 256, %s16_s10, [#allocation3]  }
   0x4   :  { %102 = dma.done.wait [#allocation3], 256  }
   0x5   :  { %103 = vsyncadd [#allocation3], 4294967040  ;;  %v23_v0 = vld [vmem:[#allocation2] sm:$0xff]  ;;  %v24_v1 = vld [vmem:[#allocation2 + $0x8] sm:$0xff]  ;;  %s107_s11 = smov [#allocation5]   ;;  %s42_s0 = sshll.u32 %s125_s1, 4  ;;  %s43_s0 = int_to_ptr.hbm [resolvable:$true] %s42_s0 }
   0x6   :  { %v25_v2 = vmul.f32 0.2, %v23_v0  ;;  %v26_v3 = vmul.f32 0.2, %v24_v1  ;;  %s40_s12 = sshll.u32 %s107_s11, 4  ;;  %s41_s12 = int_to_ptr.vmem [resolvable:$true] %s40_s12 }
   0x8   :  { %v27_v4 = vadd.f32 0.5, %v25_v2  ;;  %v28_v5 = vadd.f32 0.5, %v26_v3 }
   0xa   :  { %v29_v6 = vmax.f32 %v27_v4, 0.0  ;;  %v30_v7 = vmax.f32 %v28_v5, 0.0 }
   0xc   :  { %v31_v8 = vmin.f32 %v29_v6, 1.0  ;;  %v32_v9 = vmin.f32 %v30_v7, 1.0 }
   0xe   :  { %33 = vst [vmem:[#allocation5] sm:$0xff] %v31_v8 }
   0xf   :  { %34 = vst [vmem:[#allocation5 + $0x8] sm:$0xff] %v32_v9 }
  0x10   :  { %45 = dma.vmem_to_hbm [thread:$0]  %s41_s12, 256, %s43_s0, [#allocation4]  }
  0x11   :  { %104 = dma.done.wait [#allocation4], 256  }
  0x12   :  { %105 = vsyncadd [#allocation4], 4294967040 }
  0x13   :  { %50 = vsyncpa [#allocation3], 1 }
  0x14   :  { %51 = vsyncpa [#allocation4], 1 }

</bundles_post_ra>
